<compile_context>
chip_gen: v7x
topology: tpu7x:2x2x1
jax: 0.10.0
libtpu: 0.0.40
codegen_flags: <defaults>
</compile_context>

<pallas_src>
import functools

import jax
import jax.numpy as jnp
from jax.experimental import pallas as pl
from jax.experimental.pallas import tpu as pltpu


# ----------------------------------------------------------------------------
# Parameter init (nn.Linear-style) and one-time packing into kernel slabs.
# ----------------------------------------------------------------------------
def init_params(key, hidden_size, num_numbers):
    """Deterministic nn.Linear-style init; weights stored as [in, out] f32."""
    dims = [
        (num_numbers, 128), (128, 64), (64, 32),                 # numbers_fcn
        (hidden_size + 32, 256), (256, 128), (128, 64),          # combined_fcn
        (64, 32), (32, 16), (16, 9),
    ]
    params = []
    for (din, dout) in dims:
        key, kw, kb = jax.random.split(key, 3)
        bound = 1.0 / (din ** 0.5)
        w = jax.random.uniform(kw, (din, dout), jnp.float32, -bound, bound)
        b = jax.random.uniform(kb, (dout,), jnp.float32, -bound, bound)
        params.append((w, b))
    return params


def pack_params(params, hidden_size):
    """One-time packing: bf16 weights into two lane-aligned slabs + f32 biases.

    w128 slab: every layer whose output width <= 128, zero-padded to
               (in_padded, 128) and stacked along rows (offsets multiple of 8).
    w256 slab: the first combined layer, with the torch.cat fused:
               rows [0:H] act on pooled, rows [H:H+128] on the numbers output.
    bias slab: one f32 row per layer, zero-padded to 256 lanes.
    Zero padding keeps the math exact: padded columns get ReLU(0 + 0) = 0 and
    padded rows multiply zero activations.
    """
    (nw1, nb1), (nw2, nb2), (nw3, nb3), (cw1, cb1), (cw2, cb2), \
        (cw3, cb3), (cw4, cb4), (cw5, cb5), (cw6, cb6) = params
    H = hidden_size
    assert H % 8 == 0, "hidden size must be sublane-aligned (multiple of 8)"

    def pad_to(w, rows, cols):
        r, c = w.shape
        return jnp.pad(w, ((0, rows - r), (0, cols - c)))

    num_numbers = nw1.shape[0]
    nn_pad = max(8, -(-num_numbers // 8) * 8)

    pieces128 = [
        pad_to(nw1, nn_pad, 128),      # numbers  L1
        pad_to(nw2, 128, 128),         # numbers  L2 (valid cols :64)
        pad_to(nw3, 128, 128),         # numbers  L3 (valid cols :32)
        pad_to(cw2, 256, 128),         # combined L2
        pad_to(cw3, 128, 128),         # combined L3 (valid cols :64)
        pad_to(cw4, 128, 128),         # combined L4 (valid cols :32)
        pad_to(cw5, 128, 128),         # combined L5 (valid cols :16)
        pad_to(cw6, 128, 128),         # combined L6 / logits (valid cols :9)
    ]
    row_off, off = [], 0
    for p in pieces128:
        row_off.append(off)
        off += p.shape[0]
    row_off.append(off)
    w128 = jnp.concatenate(pieces128, axis=0).astype(jnp.bfloat16)

    w256 = jnp.concatenate([cw1[:H], pad_to(cw1[H:], 128, 256)],
                           axis=0).astype(jnp.bfloat16)

    bias = jnp.zeros((16, 256), jnp.float32)
    for i, b in enumerate([nb1, nb2, nb3, cb1, cb2, cb3, cb4, cb5, cb6]):
        bias = bias.at[i, :b.shape[0]].set(b)

    meta = dict(row_off=tuple(row_off), nn_pad=nn_pad, hidden=H)
    return w128, w256, bias, meta


# ----------------------------------------------------------------------------
# Kernel
# ----------------------------------------------------------------------------
def _customnet_kernel(pooled_ref, nums_ref, w128_ref, w256_ref, b_ref, out_ref,
                      *, ro, hidden):
    bf16 = jnp.bfloat16
    b = b_ref[...]                                           # (16, 256) f32

    def dense(x_bf16, r0, r1, bias_row, relu=True):
        # static sublane-aligned slab slice -> zero-cost ref view
        y = jnp.dot(x_bf16, w128_ref[r0:r1, :],
                    preferred_element_type=jnp.float32)
        y = y + b[bias_row:bias_row + 1, :128]
        return jnp.maximum(y, 0.0) if relu else y            # (TB, 128) f32

    # ---- numbers_fcn: Linear/ReLU x3 (Dropout = identity at inference) -----
    x = nums_ref[...].astype(bf16)                           # (TB, nn_pad)
    h = dense(x, ro[0], ro[1], 0)                            # (TB,128)
    h = dense(h.astype(bf16), ro[1], ro[2], 1)               # valid :64
    h = dense(h.astype(bf16), ro[2], ro[3], 2)               # valid :32

    # ---- combined_fcn L1: torch.cat fused into two MXU passes ---------------
    p = pooled_ref[...]                                      # (TB, H) bf16
    c = (jnp.dot(p, w256_ref[:hidden, :], preferred_element_type=jnp.float32)
         + jnp.dot(h.astype(bf16), w256_ref[hidden:, :],
                   preferred_element_type=jnp.float32)
         + b[3:4, :256])
    c = jnp.maximum(c, 0.0)                                  # (TB, 256)

    c = dense(c.astype(bf16), ro[3], ro[4], 4)               # (TB,128)
    c = dense(c.astype(bf16), ro[4], ro[5], 5)               # valid :64
    c = dense(c.astype(bf16), ro[5], ro[6], 6)               # valid :32
    c = dense(c.astype(bf16), ro[6], ro[7], 7)               # valid :16
    logits = dense(c.astype(bf16), ro[7], ro[8], 8, relu=False)  # valid :9

    # ---- out[:, :2] raw, softmax over out[:, 2:9]; padded lanes stay zero ---
    col = jax.lax.broadcasted_iota(jnp.int32, logits.shape, 1)
    is_prob = (col >= 2) & (col < 9)
    m = jnp.max(jnp.where(is_prob, logits, -jnp.inf), axis=1, keepdims=True)
    e = jnp.where(is_prob, jnp.exp(logits - m), 0.0)
    probs = e * pl.reciprocal(jnp.sum(e, axis=1, keepdims=True), approx=True)
    out_ref[...] = jnp.where(col < 2, logits, probs)


# ----------------------------------------------------------------------------
# Wrapper
# ----------------------------------------------------------------------------
def customnet_forward(pooled, numbers, packed, *, batch_tile=128):
    w128, w256, bias, meta = packed
    H, nn_pad, ro = meta["hidden"], meta["nn_pad"], meta["row_off"]

    B = pooled.shape[0]
    TB = batch_tile if B >= batch_tile else max(8, -(-B // 8) * 8)
    Bp = -(-B // TB) * TB

    # MXU operands in bf16; zero-pad batch to the tile and numbers to nn_pad.
    pooled_p = jnp.zeros((Bp, H), jnp.bfloat16).at[:B].set(
        pooled.astype(jnp.bfloat16))
    nums_p = jnp.zeros((Bp, nn_pad), jnp.float32).at[:B, :numbers.shape[1]].set(
        numbers)

    kernel = functools.partial(_customnet_kernel, ro=ro, hidden=H)

    out = pl.pallas_call(
        kernel,
        out_shape=jax.ShapeDtypeStruct((Bp, 128), jnp.float32),
        grid=(Bp // TB,),
        in_specs=[
            pl.BlockSpec((TB, H), lambda i: (i, 0)),
            pl.BlockSpec((TB, nn_pad), lambda i: (i, 0)),
            # constant block index -> weights DMA'd once, VMEM-resident
            pl.BlockSpec(w128.shape, lambda i: (0, 0)),
            pl.BlockSpec(w256.shape, lambda i: (0, 0)),
            pl.BlockSpec(bias.shape, lambda i: (0, 0)),
        ],
        out_specs=pl.BlockSpec((TB, 128), lambda i: (i, 0)),
        compiler_params=pltpu.CompilerParams(
            dimension_semantics=("parallel",),
            vmem_limit_bytes=32 * 1024 * 1024,
        ),
    )(pooled_p, nums_p, w128, w256, bias)

    # lane-dense (TB, 128) slab inside the kernel; crop to the true (B, 9).
    return out[:B, :9]


# ----------------------------------------------------------------------------
# Demo
# ----------------------------------------------------------------------------
if __name__ == "__main__":
    key = jax.random.PRNGKey(0)
    B, S, H, NUM_NUMBERS, VOCAB = 2, 8, 128, 8, 64
    k_ids, k_nums, k_emb, k_params = jax.random.split(key, 4)

    # Module inputs (shapes consistent with the PyTorch forward)
    input_ids = jax.random.randint(k_ids, (B, S), 0, VOCAB)
    attention_mask = jnp.ones((B, S), dtype=jnp.int32)
    input_numbers = jax.random.normal(k_nums, (B, 1, NUM_NUMBERS), jnp.float32)

    # TODO(synk): frozen pretrained RoBERTa encoder has no in-script Pallas
    # equivalent; a deterministic embedding lookup stands in for its CLS output.
    emb_table = jax.random.normal(k_emb, (VOCAB, H), jnp.float32) * 0.02
    pooled_output = emb_table[input_ids[:, 0]]       # (B, H) == roberta_out[:, 0, :]
    _ = attention_mask                               # consumed by the encoder

    params = init_params(k_params, H, NUM_NUMBERS)
    packed = pack_params(params, H)                  # one-time bf16 slab packing

    # nn.Linear acts on the last dim, so squeeze(1) before == after the MLP.
    numbers_2d = input_numbers.reshape(B, NUM_NUMBERS)

    out = customnet_forward(pooled_output, numbers_2d, packed)
    out = jax.block_until_ready(out)
    assert out.shape == (B, 9)
    # sanity: last 7 columns form a probability distribution
    assert bool(jnp.allclose(jnp.sum(out[:, 2:], axis=1), 1.0, atol=5e-3))
    print("KERNEL_OK")
</pallas_src>

<mosaic_0001>
module attributes {stable_mosaic.version = 11 : i64} {
  func.func @_customnet_kernel(%arg0: i32, %arg1: memref<8x128xbf16, #tpu.memory_space<vmem>>, %arg2: memref<8x8xf32, #tpu.memory_space<vmem>>, %arg3: memref<1032x128xbf16, #tpu.memory_space<vmem>>, %arg4: memref<256x256xbf16, #tpu.memory_space<vmem>>, %arg5: memref<16x256xf32, #tpu.memory_space<vmem>>, %arg6: memref<8x128xf32, #tpu.memory_space<vmem>>) attributes {dimension_semantics = [#tpu.dimension_semantics<parallel>], iteration_bounds = array<i64: 1>, scalar_prefetch = 0 : i64, scratch_operands = 0 : i64, tpu.core_type = #tpu.core_type<tc>, window_params = [{transform_indices = @transform_0, window_bounds = array<i64: 8, 128>}, {transform_indices = @transform_1, window_bounds = array<i64: 8, 8>}, {pipeline_mode = #tpu.pipeline_mode<synchronous>, transform_indices = @transform_2, window_bounds = array<i64: 1032, 128>}, {pipeline_mode = #tpu.pipeline_mode<synchronous>, transform_indices = @transform_3, window_bounds = array<i64: 256, 256>}, {pipeline_mode = #tpu.pipeline_mode<synchronous>, transform_indices = @transform_4, window_bounds = array<i64: 16, 256>}, {transform_indices = @transform_5, window_bounds = array<i64: 8, 128>}]} {
    %c0 = arith.constant 0 : index
    %c0_0 = arith.constant 0 : index
    %0 = vector.load %arg5[%c0, %c0_0] : memref<16x256xf32, #tpu.memory_space<vmem>>, vector<16x256xf32>
    %c0_1 = arith.constant 0 : index
    %c0_2 = arith.constant 0 : index
    %1 = vector.load %arg2[%c0_1, %c0_2] : memref<8x8xf32, #tpu.memory_space<vmem>>, vector<8x8xf32>
    %2 = arith.truncf %1 : vector<8x8xf32> to vector<8x8xbf16>
    %c0_3 = arith.constant 0 : index
    %c0_4 = arith.constant 0 : index
    %3 = vector.load %arg3[%c0_3, %c0_4] : memref<1032x128xbf16, #tpu.memory_space<vmem>>, vector<8x128xbf16>
    %cst = arith.constant dense<0.000000e+00> : vector<8x128xf32>
    %4 = tpu.matmul %2, %3, %cst {dimension_numbers = #tpu.dot_dimension_numbers<[1], [0], [0], [1], [0, 0, 1, 1], [], []>} : vector<8x8xbf16>, vector<8x128xbf16>, vector<8x128xf32> -> vector<8x128xf32>
    %5 = vector.extract_strided_slice %0 {offsets = [0, 0], sizes = [1, 128], strides = [1, 1]} : vector<16x256xf32> to vector<1x128xf32>
    %6 = vector.broadcast %5 : vector<1x128xf32> to vector<8x128xf32>
    %7 = arith.addf %4, %6 : vector<8x128xf32>
    %cst_5 = arith.constant 0.000000e+00 : f32
    %8 = vector.broadcast %cst_5 : f32 to vector<8x128xf32>
    %9 = arith.maximumf %7, %8 : vector<8x128xf32>
    %10 = arith.truncf %9 : vector<8x128xf32> to vector<8x128xbf16>
    %c8 = arith.constant 8 : index
    %c0_6 = arith.constant 0 : index
    %11 = vector.load %arg3[%c8, %c0_6] : memref<1032x128xbf16, #tpu.memory_space<vmem>>, vector<128x128xbf16>
    %cst_7 = arith.constant dense<0.000000e+00> : vector<8x128xf32>
    %12 = tpu.matmul %10, %11, %cst_7 {dimension_numbers = #tpu.dot_dimension_numbers<[1], [0], [0], [1], [0, 0, 1, 1], [], []>} : vector<8x128xbf16>, vector<128x128xbf16>, vector<8x128xf32> -> vector<8x128xf32>
    %13 = vector.extract_strided_slice %0 {offsets = [1, 0], sizes = [1, 128], strides = [1, 1]} : vector<16x256xf32> to vector<1x128xf32>
    %14 = vector.broadcast %13 : vector<1x128xf32> to vector<8x128xf32>
    %15 = arith.addf %12, %14 : vector<8x128xf32>
    %cst_8 = arith.constant 0.000000e+00 : f32
    %16 = vector.broadcast %cst_8 : f32 to vector<8x128xf32>
    %17 = arith.maximumf %15, %16 : vector<8x128xf32>
    %18 = arith.truncf %17 : vector<8x128xf32> to vector<8x128xbf16>
    %c136 = arith.constant 136 : index
    %c0_9 = arith.constant 0 : index
    %19 = vector.load %arg3[%c136, %c0_9] : memref<1032x128xbf16, #tpu.memory_space<vmem>>, vector<128x128xbf16>
    %cst_10 = arith.constant dense<0.000000e+00> : vector<8x128xf32>
    %20 = tpu.matmul %18, %19, %cst_10 {dimension_numbers = #tpu.dot_dimension_numbers<[1], [0], [0], [1], [0, 0, 1, 1], [], []>} : vector<8x128xbf16>, vector<128x128xbf16>, vector<8x128xf32> -> vector<8x128xf32>
    %21 = vector.extract_strided_slice %0 {offsets = [2, 0], sizes = [1, 128], strides = [1, 1]} : vector<16x256xf32> to vector<1x128xf32>
    %22 = vector.broadcast %21 : vector<1x128xf32> to vector<8x128xf32>
    %23 = arith.addf %20, %22 : vector<8x128xf32>
    %cst_11 = arith.constant 0.000000e+00 : f32
    %24 = vector.broadcast %cst_11 : f32 to vector<8x128xf32>
    %25 = arith.maximumf %23, %24 : vector<8x128xf32>
    %c0_12 = arith.constant 0 : index
    %c0_13 = arith.constant 0 : index
    %26 = vector.load %arg1[%c0_12, %c0_13] : memref<8x128xbf16, #tpu.memory_space<vmem>>, vector<8x128xbf16>
    %c0_14 = arith.constant 0 : index
    %c0_15 = arith.constant 0 : index
    %27 = vector.load %arg4[%c0_14, %c0_15] : memref<256x256xbf16, #tpu.memory_space<vmem>>, vector<128x256xbf16>
    %cst_16 = arith.constant dense<0.000000e+00> : vector<8x256xf32>
    %28 = tpu.matmul %26, %27, %cst_16 {dimension_numbers = #tpu.dot_dimension_numbers<[1], [0], [0], [1], [0, 0, 1, 1], [], []>} : vector<8x128xbf16>, vector<128x256xbf16>, vector<8x256xf32> -> vector<8x256xf32>
    %29 = arith.truncf %25 : vector<8x128xf32> to vector<8x128xbf16>
    %c128 = arith.constant 128 : index
    %c0_17 = arith.constant 0 : index
    %30 = vector.load %arg4[%c128, %c0_17] : memref<256x256xbf16, #tpu.memory_space<vmem>>, vector<128x256xbf16>
    %cst_18 = arith.constant dense<0.000000e+00> : vector<8x256xf32>
    %31 = tpu.matmul %29, %30, %cst_18 {dimension_numbers = #tpu.dot_dimension_numbers<[1], [0], [0], [1], [0, 0, 1, 1], [], []>} : vector<8x128xbf16>, vector<128x256xbf16>, vector<8x256xf32> -> vector<8x256xf32>
    %32 = arith.addf %28, %31 : vector<8x256xf32>
    %33 = vector.extract_strided_slice %0 {offsets = [3, 0], sizes = [1, 256], strides = [1, 1]} : vector<16x256xf32> to vector<1x256xf32>
    %34 = vector.broadcast %33 : vector<1x256xf32> to vector<8x256xf32>
    %35 = arith.addf %32, %34 : vector<8x256xf32>
    %cst_19 = arith.constant 0.000000e+00 : f32
    %36 = vector.broadcast %cst_19 : f32 to vector<8x256xf32>
    %37 = arith.maximumf %35, %36 : vector<8x256xf32>
    %38 = arith.truncf %37 : vector<8x256xf32> to vector<8x256xbf16>
    %c264 = arith.constant 264 : index
    %c0_20 = arith.constant 0 : index
    %39 = vector.load %arg3[%c264, %c0_20] : memref<1032x128xbf16, #tpu.memory_space<vmem>>, vector<256x128xbf16>
    %cst_21 = arith.constant dense<0.000000e+00> : vector<8x128xf32>
    %40 = tpu.matmul %38, %39, %cst_21 {dimension_numbers = #tpu.dot_dimension_numbers<[1], [0], [0], [1], [0, 0, 1, 1], [], []>} : vector<8x256xbf16>, vector<256x128xbf16>, vector<8x128xf32> -> vector<8x128xf32>
    %41 = vector.extract_strided_slice %0 {offsets = [4, 0], sizes = [1, 128], strides = [1, 1]} : vector<16x256xf32> to vector<1x128xf32>
    %42 = vector.broadcast %41 : vector<1x128xf32> to vector<8x128xf32>
    %43 = arith.addf %40, %42 : vector<8x128xf32>
    %cst_22 = arith.constant 0.000000e+00 : f32
    %44 = vector.broadcast %cst_22 : f32 to vector<8x128xf32>
    %45 = arith.maximumf %43, %44 : vector<8x128xf32>
    %46 = arith.truncf %45 : vector<8x128xf32> to vector<8x128xbf16>
    %c520 = arith.constant 520 : index
    %c0_23 = arith.constant 0 : index
    %47 = vector.load %arg3[%c520, %c0_23] : memref<1032x128xbf16, #tpu.memory_space<vmem>>, vector<128x128xbf16>
    %cst_24 = arith.constant dense<0.000000e+00> : vector<8x128xf32>
    %48 = tpu.matmul %46, %47, %cst_24 {dimension_numbers = #tpu.dot_dimension_numbers<[1], [0], [0], [1], [0, 0, 1, 1], [], []>} : vector<8x128xbf16>, vector<128x128xbf16>, vector<8x128xf32> -> vector<8x128xf32>
    %49 = vector.extract_strided_slice %0 {offsets = [5, 0], sizes = [1, 128], strides = [1, 1]} : vector<16x256xf32> to vector<1x128xf32>
    %50 = vector.broadcast %49 : vector<1x128xf32> to vector<8x128xf32>
    %51 = arith.addf %48, %50 : vector<8x128xf32>
    %cst_25 = arith.constant 0.000000e+00 : f32
    %52 = vector.broadcast %cst_25 : f32 to vector<8x128xf32>
    %53 = arith.maximumf %51, %52 : vector<8x128xf32>
    %54 = arith.truncf %53 : vector<8x128xf32> to vector<8x128xbf16>
    %c648 = arith.constant 648 : index
    %c0_26 = arith.constant 0 : index
    %55 = vector.load %arg3[%c648, %c0_26] : memref<1032x128xbf16, #tpu.memory_space<vmem>>, vector<128x128xbf16>
    %cst_27 = arith.constant dense<0.000000e+00> : vector<8x128xf32>
    %56 = tpu.matmul %54, %55, %cst_27 {dimension_numbers = #tpu.dot_dimension_numbers<[1], [0], [0], [1], [0, 0, 1, 1], [], []>} : vector<8x128xbf16>, vector<128x128xbf16>, vector<8x128xf32> -> vector<8x128xf32>
    %57 = vector.extract_strided_slice %0 {offsets = [6, 0], sizes = [1, 128], strides = [1, 1]} : vector<16x256xf32> to vector<1x128xf32>
    %58 = vector.broadcast %57 : vector<1x128xf32> to vector<8x128xf32>
    %59 = arith.addf %56, %58 : vector<8x128xf32>
    %cst_28 = arith.constant 0.000000e+00 : f32
    %60 = vector.broadcast %cst_28 : f32 to vector<8x128xf32>
    %61 = arith.maximumf %59, %60 : vector<8x128xf32>
    %62 = arith.truncf %61 : vector<8x128xf32> to vector<8x128xbf16>
    %c776 = arith.constant 776 : index
    %c0_29 = arith.constant 0 : index
    %63 = vector.load %arg3[%c776, %c0_29] : memref<1032x128xbf16, #tpu.memory_space<vmem>>, vector<128x128xbf16>
    %cst_30 = arith.constant dense<0.000000e+00> : vector<8x128xf32>
    %64 = tpu.matmul %62, %63, %cst_30 {dimension_numbers = #tpu.dot_dimension_numbers<[1], [0], [0], [1], [0, 0, 1, 1], [], []>} : vector<8x128xbf16>, vector<128x128xbf16>, vector<8x128xf32> -> vector<8x128xf32>
    %65 = vector.extract_strided_slice %0 {offsets = [7, 0], sizes = [1, 128], strides = [1, 1]} : vector<16x256xf32> to vector<1x128xf32>
    %66 = vector.broadcast %65 : vector<1x128xf32> to vector<8x128xf32>
    %67 = arith.addf %64, %66 : vector<8x128xf32>
    %cst_31 = arith.constant 0.000000e+00 : f32
    %68 = vector.broadcast %cst_31 : f32 to vector<8x128xf32>
    %69 = arith.maximumf %67, %68 : vector<8x128xf32>
    %70 = arith.truncf %69 : vector<8x128xf32> to vector<8x128xbf16>
    %c904 = arith.constant 904 : index
    %c0_32 = arith.constant 0 : index
    %71 = vector.load %arg3[%c904, %c0_32] : memref<1032x128xbf16, #tpu.memory_space<vmem>>, vector<128x128xbf16>
    %cst_33 = arith.constant dense<0.000000e+00> : vector<8x128xf32>
    %72 = tpu.matmul %70, %71, %cst_33 {dimension_numbers = #tpu.dot_dimension_numbers<[1], [0], [0], [1], [0, 0, 1, 1], [], []>} : vector<8x128xbf16>, vector<128x128xbf16>, vector<8x128xf32> -> vector<8x128xf32>
    %73 = vector.extract_strided_slice %0 {offsets = [8, 0], sizes = [1, 128], strides = [1, 1]} : vector<16x256xf32> to vector<1x128xf32>
    %74 = vector.broadcast %73 : vector<1x128xf32> to vector<8x128xf32>
    %75 = arith.addf %72, %74 : vector<8x128xf32>
    %76 = tpu.iota {dimensions = array<i32: 1>} : vector<8x128xi32>
    %c2_i32 = arith.constant 2 : i32
    %77 = vector.broadcast %c2_i32 : i32 to vector<8x128xi32>
    %78 = arith.cmpi sge, %76, %77 : vector<8x128xi32>
    %c9_i32 = arith.constant 9 : i32
    %79 = vector.broadcast %c9_i32 : i32 to vector<8x128xi32>
    %80 = arith.cmpi slt, %76, %79 : vector<8x128xi32>
    %81 = arith.andi %78, %80 : vector<8x128xi1>
    %cst_34 = arith.constant 0xFF800000 : f32
    %82 = vector.broadcast %cst_34 : f32 to vector<8x128xf32>
    %83 = arith.select %81, %75, %82 : vector<8x128xi1>, vector<8x128xf32>
    %cst_35 = arith.constant dense<0xFF800000> : vector<8xf32>
    %84 = vector.multi_reduction <maximumf>, %83, %cst_35 [1] : vector<8x128xf32> to vector<8xf32>
    %85 = vector.shape_cast %84 : vector<8xf32> to vector<8x1xf32>
    %86 = vector.broadcast %85 : vector<8x1xf32> to vector<8x128xf32>
    %87 = arith.subf %75, %86 : vector<8x128xf32>
    %88 = math.exp %87 : vector<8x128xf32>
    %cst_36 = arith.constant 0.000000e+00 : f32
    %89 = vector.broadcast %cst_36 : f32 to vector<8x128xf32>
    %90 = arith.select %81, %88, %89 : vector<8x128xi1>, vector<8x128xf32>
    %cst_37 = arith.constant dense<0.000000e+00> : vector<8xf32>
    %91 = vector.multi_reduction <add>, %90, %cst_37 [1] : vector<8x128xf32> to vector<8xf32>
    %92 = vector.shape_cast %91 : vector<8xf32> to vector<8x1xf32>
    %93 = tpu.reciprocal %92 {approx = true} : vector<8x1xf32> -> vector<8x1xf32>
    %94 = vector.broadcast %93 : vector<8x1xf32> to vector<8x128xf32>
    %95 = arith.mulf %90, %94 : vector<8x128xf32>
    %c2_i32_38 = arith.constant 2 : i32
    %96 = vector.broadcast %c2_i32_38 : i32 to vector<8x128xi32>
    %97 = arith.cmpi slt, %76, %96 : vector<8x128xi32>
    %98 = arith.select %97, %75, %95 : vector<8x128xi1>, vector<8x128xf32>
    %c0_39 = arith.constant 0 : index
    %c0_40 = arith.constant 0 : index
    %99 = vector.load %arg6[%c0_39, %c0_40] : memref<8x128xf32, #tpu.memory_space<vmem>>, vector<8x128xf32>
    tpu.vector_store %arg6[%c0_39, %c0_40], %98 {strides = array<i32>} : memref<8x128xf32, #tpu.memory_space<vmem>>, vector<8x128xf32>,
    return
  }
  func.func @transform_0(%arg0: i32) -> (i32, i32) {
    %c0_i32 = arith.constant 0 : i32
    %c0_i32_0 = arith.constant 0 : i32
    return %arg0, %c0_i32 : i32, i32
  }
  func.func @transform_1(%arg0: i32) -> (i32, i32) {
    %c0_i32 = arith.constant 0 : i32
    %c0_i32_0 = arith.constant 0 : i32
    return %arg0, %c0_i32 : i32, i32
  }
  func.func @transform_2(%arg0: i32) -> (i32, i32) {
    %c0_i32 = arith.constant 0 : i32
    %c0_i32_0 = arith.constant 0 : i32
    %c0_i32_1 = arith.constant 0 : i32
    return %c0_i32, %c0_i32_0 : i32, i32
  }
  func.func @transform_3(%arg0: i32) -> (i32, i32) {
    %c0_i32 = arith.constant 0 : i32
    %c0_i32_0 = arith.constant 0 : i32
    %c0_i32_1 = arith.constant 0 : i32
    return %c0_i32, %c0_i32_0 : i32, i32
  }
  func.func @transform_4(%arg0: i32) -> (i32, i32) {
    %c0_i32 = arith.constant 0 : i32
    %c0_i32_0 = arith.constant 0 : i32
    %c0_i32_1 = arith.constant 0 : i32
    return %c0_i32, %c0_i32_0 : i32, i32
  }
  func.func @transform_5(%arg0: i32) -> (i32, i32) {
    %c0_i32 = arith.constant 0 : i32
    %c0_i32_0 = arith.constant 0 : i32
    return %arg0, %c0_i32 : i32, i32
  }
}

</mosaic_0001>

<bundles_post_ra>
// kernel: tpu_custom_call.1
= control target key start
LH: loop header
LB: loop body
LE: loop exit
PB: predicated region body
PF: predicated region fallthrough
CT: control target
= control target key end

     0   :  { %10 = vsyncpa [#allocation3], 0  ;;  %s2095_s0 = inlined_call_operand.hbm [shape: bf16[8,128], index: 0, kind: input, shape index: {}]   ;;  %s2096_s1 = inlined_call_operand.hbm [shape: f32[8,8], index: 1, kind: input, shape index: {}]   ;;  %s2097_s2 = inlined_call_operand.hbm [shape: bf16[1032,128], index: 2, kind: input, shape index: {}]   ;;  %s2098_s3 = inlined_call_operand.hbm [shape: bf16[256,256], index: 3, kind: input, shape index: {}]   ;;  %s2099_s4 = inlined_call_operand.hbm [shape: f32[16,256], index: 4, kind: input, shape index: {}]   ;;  %s2100_s5 = inlined_call_operand.hbm [shape: f32[8,128], index: 5, kind: output, shape index: {}]  }
   0x1   :  { %11 = vsyncpa [#allocation6], 0 }
   0x2   :  { %12 = vsyncpa [#allocation9], 0 }
   0x3   :  { %13 = vsyncpa [#allocation4], 0  ;;  %s1875_s18 = smov [#allocation5]   ;;  %s1876_s20 = smov [#allocation8]  }
   0x4   :  { %s30_s19 = sshll.u32 %s1875_s18, 4  ;;  %s51_s21 = sshll.u32 %s1876_s20, 4  ;;  %s31_s19 = int_to_ptr.vmem [resolvable:$true] %s30_s19  ;;  %s1920_s21 = int_to_ptr.vmem [resolvable:$true] %s51_s21 }
   0x5   :  { %s1735_s24 = scalar_lea.hbm %s2096_s1, 128 }
   0x6   :  { %p1736_p0 = scmp.ne.s32.totalorder %s2096_s1, %s1735_s24  ;;  %p1739_p1 = scmp.lt.u32.totalorder %s1735_s24, %s2096_s1 }
   0x8   :  { %p1741_p2 = pnand %p1739_p1, %p1736_p0 }
   0xa   :  { %1744 = shalt.err (!%p1741_p2)
}
   0xb   :  { %s1745_s29 = scalar_lea.vmem %s31_s19, 128  ;;  %p1750_p4 = scmp.lt.s32.totalorder %s31_s19, %s31_s19 }
   0xc   :  { %p1746_p3 = scmp.ne.s32.totalorder %s31_s19, %s1745_s29  ;;  %p1751_p5 = scmp.lt.s32.totalorder %s1745_s29, %s1745_s29 }
   0xe   :  { %p1752_p6 = por %p1751_p5, %p1750_p4 }
  0x10   :  { %p1753_p7 = pnand %p1752_p6, %p1746_p3 }
  0x12   :  { %1756 = shalt.err (!%p1753_p7)
}
  0x13   :  { %33 = dma.hbm_to_vmem [thread:$0]  %s2096_s1, 128, %s31_s19, [#allocation6]  }
  0x14   :  { %s1757_s9 = scalar_lea.hbm %s2098_s3, 4096 }
  0x15   :  { %p1758_p8 = scmp.ne.s32.totalorder %s2098_s3, %s1757_s9  ;;  %p1761_p9 = scmp.lt.u32.totalorder %s1757_s9, %s2098_s3 }
  0x17   :  { %p1763_p10 = pnand %p1761_p9, %p1758_p8 }
  0x19   :  { %1766 = shalt.err (!%p1763_p10)
}
  0x1a   :  { %s1767_s14 = scalar_lea.vmem %s1920_s21, 4096  ;;  %p1772_p12 = scmp.lt.s32.totalorder %s1920_s21, %s1920_s21 }
  0x1b   :  { %p1768_p11 = scmp.ne.s32.totalorder %s1920_s21, %s1767_s14  ;;  %p1773_p13 = scmp.lt.s32.totalorder %s1767_s14, %s1767_s14 }
  0x1d   :  { %p1774_p0 = por %p1773_p13, %p1772_p12 }
  0x1f   :  { %p1775_p1 = pnand %p1774_p0, %p1768_p11 }
  0x21   :  { %1778 = shalt.err (!%p1775_p1)
}
  0x22   :  { %s1877_s1 = smov 128   ;;  %s1878_s15 = smov 8  }
  0x23   :  { %57 = dma.hbm_to_vmem [thread:$0]  %s2098_s3, 4096, %s1920_s21, [#allocation9], %s1877_s1, %s1877_s1, %s1878_s15  }
  0x24   :  { %s1879_s18 = smov [#allocation2]   ;;  %s1880_s20 = smov [#allocation7]  }
  0x25   :  { %s20_s19 = sshll.u32 %s1879_s18, 4  ;;  %s39_s22 = sshll.u32 %s1880_s20, 4  ;;  %s21_s19 = int_to_ptr.vmem [resolvable:$true] %s20_s19  ;;  %s1951_s22 = int_to_ptr.vmem [resolvable:$true] %s39_s22 }
  0x26   :  { %s1779_s25 = scalar_lea.hbm %s2095_s0, 64 }
  0x27   :  { %p1780_p2 = scmp.ne.s32.totalorder %s2095_s0, %s1779_s25  ;;  %p1783_p3 = scmp.lt.u32.totalorder %s1779_s25, %s2095_s0 }
  0x29   :  { %p1785_p4 = pnand %p1783_p3, %p1780_p2 }
  0x2b   :  { %1788 = shalt.err (!%p1785_p4)
}
  0x2c   :  { %s1789_s3 = scalar_lea.vmem %s21_s19, 64  ;;  %p1794_p6 = scmp.lt.s32.totalorder %s21_s19, %s21_s19 }
  0x2d   :  { %p1790_p5 = scmp.ne.s32.totalorder %s21_s19, %s1789_s3  ;;  %p1795_p7 = scmp.lt.s32.totalorder %s1789_s3, %s1789_s3 }
  0x2f   :  { %p1796_p8 = por %p1795_p7, %p1794_p6 }
  0x31   :  { %p1797_p9 = pnand %p1796_p8, %p1790_p5 }
  0x33   :  { %1800 = shalt.err (!%p1797_p9)
}
  0x34   :  { %23 = dma.hbm_to_vmem [thread:$0]  %s2095_s0, 64, %s21_s19, [#allocation3]  }
  0x35   :  { %s1801_s8 = scalar_lea.hbm %s2097_s2, 8256 }
  0x36   :  { %p1802_p10 = scmp.ne.s32.totalorder %s2097_s2, %s1801_s8  ;;  %p1805_p11 = scmp.lt.u32.totalorder %s1801_s8, %s2097_s2 }
  0x38   :  { %p1807_p12 = pnand %p1805_p11, %p1802_p10 }
  0x3a   :  { %1810 = shalt.err (!%p1807_p12)
}
  0x3b   :  { %s1811_s13 = scalar_lea.vmem %s1951_s22, 8256  ;;  %p1816_p0 = scmp.lt.s32.totalorder %s1951_s22, %s1951_s22 }
  0x3c   :  { %p1812_p13 = scmp.ne.s32.totalorder %s1951_s22, %s1811_s13  ;;  %p1817_p1 = scmp.lt.s32.totalorder %s1811_s13, %s1811_s13 }
  0x3e   :  { %p1818_p2 = por %p1817_p1, %p1816_p0 }
  0x40   :  { %p1819_p3 = pnand %p1818_p2, %p1812_p13 }
  0x42   :  { %1822 = shalt.err (!%p1819_p3)
}
  0x43   :  { %s1881_s0 = smov 64   ;;  %s1882_s14 = smov 4  }
  0x44   :  { %45 = dma.hbm_to_vmem [thread:$0]  %s2097_s2, 8256, %s1951_s22, [#allocation6], %s1881_s0, %s1881_s0, %s1882_s14  }
  0x45   :  { %s1883_s16 = smov [#allocation10]   ;;  %s1823_s20 = scalar_lea.hbm %s2099_s4, 512 }
  0x46   :  { %s63_s17 = sshll.u32 %s1883_s16, 4  ;;  %p1824_p4 = scmp.ne.s32.totalorder %s2099_s4, %s1823_s20  ;;  %s64_s17 = int_to_ptr.vmem [resolvable:$true] %s63_s17 }
  0x47   :  { %p1827_p5 = scmp.lt.u32.totalorder %s1823_s20, %s2099_s4 }
  0x49   :  { %p1829_p6 = pnand %p1827_p5, %p1824_p4 }
  0x4b   :  { %1832 = shalt.err (!%p1829_p6)
}
  0x4c   :  { %s1833_s27 = scalar_lea.vmem %s64_s17, 512  ;;  %p1838_p8 = scmp.lt.s32.totalorder %s64_s17, %s64_s17 }
  0x4d   :  { %p1834_p7 = scmp.ne.s32.totalorder %s64_s17, %s1833_s27  ;;  %p1839_p9 = scmp.lt.s32.totalorder %s1833_s27, %s1833_s27 }
  0x4f   :  { %p1840_p10 = por %p1839_p9, %p1838_p8 }
  0x51   :  { %p1841_p11 = pnand %p1840_p10, %p1834_p7 }
  0x53   :  { %1844 = shalt.err (!%p1841_p11)
}
  0x54   :  { %s1884_s2 = smov 256   ;;  %s1885_s22 = smov 16  }
  0x55   :  { %69 = dma.hbm_to_vmem [thread:$0]  %s2099_s4, 512, %s64_s17, [#allocation9], %s1884_s2, %s1884_s2, %s1885_s22  }
  0x56   :  { %1867 = dma.done.wait [#allocation3], 64  }
  0x57   :  { %1868 = vsyncadd [#allocation3], 4294967232 }
  0x58   :  { %1869 = dma.done.wait [#allocation6], 8384  }
  0x59   :  { %1870 = vsyncadd [#allocation6], 4294958912 }
  0x5a   :  { %1871 = dma.done.wait [#allocation9], 4608  }
  0x5b   :  { %1872 = vsyncadd [#allocation9], 4294962688  ;;  %v1886_v0 = vmov 0.0   ;;  %vm1887_vm0 = vmmov 0   ;;  %vm100_vm1 = vcmask 1043456   ;;  %v89_v2 = vld [vmem:[#allocation5] sm:$0xff]  ;;  %v92_v19 = vlaneseq }
  0x5c   :  { %1478 = vmatprep.subr.bf16.mxu0 %v1886_v0  ;;  %1480 = vmatprep.mubr.msk.bf16.mxu0 %vm1887_vm0, %v1886_v0  ;;  %v91_v1 = vld [vmem:[#allocation7] sm:$0xf]  ;;  %v90_v4 = vpack.c.bf16 %v89_v2, %v89_v2  ;;  %v1619_v5 = vld [vmem:[#allocation7 + $0x4] sm:$0xff]   ;;  %vm96_vm2 = vcmask 64512   ;;  %v1620_v6 = vld [vmem:[#allocation7 + $0xc] sm:$0xff]   ;;  %s1889_s4 = smov [#allocation11]  }
  0x5d   :  { %1484 = vmatprep.subr.bf16.mxu1 %v1886_v0  ;;  %1500 = vmatprep.mubr.msk.bf16.mxu1 %vm1887_vm0, %v1886_v0  ;;  %v102_v3 = vsel %vm100_vm1, %v91_v1, 0  ;;  %v1621_v7 = vld [vmem:[#allocation7 + $0x14] sm:$0xff]   ;;  %v1622_v8 = vld [vmem:[#allocation7 + $0x1c] sm:$0xff]   ;;  %v1623_v9 = vld [vmem:[#allocation7 + $0x24] sm:$0xff]   ;;  %v2017_v20 = vshrl.u32 %v92_v19, 7  ;;  %s1292_s3 = sshll.u32 %s1889_s4, 4  ;;  %s1293_s3 = int_to_ptr.vmem [resolvable:$true] %s1292_s3 }
  0x5e   :  { %1479 = vmatpush3.bf16.msra.mxu0 %v102_v3  ;;  %1485 = vmatpush3.bf16.msra.mxu1 %v1619_v5  ;;  %v1624_v10 = vld [vmem:[#allocation7 + $0x2c] sm:$0xff]   ;;  %v1625_v11 = vld [vmem:[#allocation7 + $0x34] sm:$0xff]   ;;  %v1626_v12 = vld [vmem:[#allocation7 + $0x3c] sm:$0xff]   ;;  %s1845_s21 = scalar_lea.vmem %s1293_s3, 128  ;;  %p1850_p13 = scmp.lt.s32.totalorder %s1293_s3, %s1293_s3 }
  0x5f   :  { %1504 = vmatprep.subr.bf16.mxu0 %v1886_v0  ;;  %1486 = vmatprep.subr.bf16.mxu1 %v1886_v0  ;;  %v1627_v13 = vld [vmem:[#allocation7 + $0x44] sm:$0xff]   ;;  %v1628_v14 = vld [vmem:[#allocation7 + $0x4c] sm:$0xff]   ;;  %v1629_v15 = vld [vmem:[#allocation7 + $0x54] sm:$0xff]   ;;  %v94_v21 = vsub.s32 0, %v2017_v20  ;;  %v164_v48 = vsub.s32 1, %v2017_v20  ;;  %p1846_p12 = scmp.ne.s32.totalorder %s1293_s3, %s1845_s21  ;;  %p1851_p0 = scmp.lt.s32.totalorder %s1845_s21, %s1845_s21 }
  0x60   :  { %v1630_v16 = vld [vmem:[#allocation7 + $0x5c] sm:$0xff]   ;;  %v1631_v17 = vld [vmem:[#allocation7 + $0x64] sm:$0xff]   ;;  %v1632_v18 = vld [vmem:[#allocation7 + $0x6c] sm:$0xff]  }
  0x61   :  { %1481 = vmatmul.mubr.msk.bf16.vlgmr.msra.gmra.mrb[0].mxu0 %vm96_vm2, %v90_v4  ;;  %v2020_v22 = vld [vmem:[#allocation10] sm:$0xff]  ;;  %v1633_v31 = vld [vmem:[#allocation7 + $0x74] sm:$0xff]   ;;  %v1634_v32 = vld [vmem:[#allocation7 + $0x7c] sm:$0xff]   ;;  %p1852_p1 = por %p1851_p0, %p1850_p13 }
  0x62   :  { %1520 = vmatprep.mubr.msk.bf16.mxu0 %vm1887_vm0, %v1886_v0  ;;  %1487 = vmatpush3.bf16.msra.mxu1 %v1620_v6  ;;  %v95_v23 = vrot.slane %v2020_v22, %v94_v21  ;;  %v1637_v33 = vld [vmem:[#allocation8 + $0x4] ss:$8 sps:$4 sm:$0xff]   ;;  %v1638_v34 = vld [vmem:[#allocation8 + $0x80] ss:$8 sps:$4 sm:$0xff]   ;;  %v1644_v36 = vld [vmem:[#allocation8 + $0x90] ss:$8 sps:$4 sm:$0xff]   ;;  %v165_v49 = vrot.slane %v2020_v22, %v164_v48 }
  0x63   :  { %1488 = vmatprep.subr.bf16.mxu1 %v1886_v0  ;;  %1505 = vmatpush3.bf16.msra.mxu0 %v1627_v13  ;;  %v1640_v35 = vld [vmem:[#allocation8 + $0x84] ss:$8 sps:$4 sm:$0xff]   ;;  %v1646_v37 = vld [vmem:[#allocation8 + $0x94] ss:$8 sps:$4 sm:$0xff]   ;;  %v1650_v38 = vld [vmem:[#allocation8 + $0xa0] ss:$8 sps:$4 sm:$0xff]   ;;  %p1853_p2 = pnand %p1852_p1, %p1846_p12 }
  0x64   :  { %1506 = vmatprep.subr.bf16.mxu0 %v1886_v0  ;;  %v1652_v39 = vld [vmem:[#allocation8 + $0xa4] ss:$8 sps:$4 sm:$0xff]   ;;  %v1656_v40 = vld [vmem:[#allocation8 + $0xb0] ss:$8 sps:$4 sm:$0xff]   ;;  %v1658_v41 = vld [vmem:[#allocation8 + $0xb4] ss:$8 sps:$4 sm:$0xff]  }
  0x65   :  { %v1662_v42 = vld [vmem:[#allocation8 + $0xc0] ss:$8 sps:$4 sm:$0xff]   ;;  %v1664_v43 = vld [vmem:[#allocation8 + $0xc4] ss:$8 sps:$4 sm:$0xff]   ;;  %v1668_v44 = vld [vmem:[#allocation8 + $0xd0] ss:$8 sps:$4 sm:$0xff]  }
  0x66   :  { %1489 = vmatpush3.bf16.msra.mxu1 %v1621_v7  ;;  %v1670_v45 = vld [vmem:[#allocation8 + $0xd4] ss:$8 sps:$4 sm:$0xff]   ;;  %v1674_v46 = vld [vmem:[#allocation8 + $0xe0] ss:$8 sps:$4 sm:$0xff]   ;;  %v1676_v47 = vld [vmem:[#allocation8 + $0xe4] ss:$8 sps:$4 sm:$0xff]  }
  0x67   :  { %1490 = vmatprep.subr.bf16.mxu1 %v1886_v0  ;;  %1507 = vmatpush3.bf16.msra.mxu0 %v1628_v14  ;;  %v1635_v56 = vld [vmem:[#allocation8] ss:$8 sps:$4 sm:$0xff]   ;;  %v1643_v58 = vld [vmem:[#allocation8 + $0x14] ss:$8 sps:$4 sm:$0xff]   ;;  %v1641_v59 = vld [vmem:[#allocation8 + $0x10] ss:$8 sps:$4 sm:$0xff]  }
  0x68   :  { %1508 = vmatprep.subr.bf16.mxu0 %v1886_v0  ;;  %v1649_v60 = vld [vmem:[#allocation8 + $0x24] ss:$8 sps:$4 sm:$0xff]   ;;  %v1647_v61 = vld [vmem:[#allocation8 + $0x20] ss:$8 sps:$4 sm:$0xff]   ;;  %v1655_v62 = vld [vmem:[#allocation8 + $0x34] ss:$8 sps:$4 sm:$0xff]  }
  0x69   :  { %v1653_v63 = vld [vmem:[#allocation8 + $0x30] ss:$8 sps:$4 sm:$0xff]   ;;  %v1661_v1 = vld [vmem:[#allocation8 + $0x44] ss:$8 sps:$4 sm:$0xff]   ;;  %v1659_v2 = vld [vmem:[#allocation8 + $0x40] ss:$8 sps:$4 sm:$0xff]  }
  0x6a   :  { %1491 = vmatpush3.bf16.msra.mxu1 %v1622_v8  ;;  %v1667_v3 = vld [vmem:[#allocation8 + $0x54] ss:$8 sps:$4 sm:$0xff]   ;;  %v1665_v4 = vld [vmem:[#allocation8 + $0x50] ss:$8 sps:$4 sm:$0xff]   ;;  %v1673_v5 = vld [vmem:[#allocation8 + $0x64] ss:$8 sps:$4 sm:$0xff]  }
  0x6b   :  { %1492 = vmatprep.subr.bf16.mxu1 %v1886_v0  ;;  %1509 = vmatpush3.bf16.msra.mxu0 %v1629_v15  ;;  %v1671_v6 = vld [vmem:[#allocation8 + $0x60] ss:$8 sps:$4 sm:$0xff]   ;;  %v1679_v7 = vld [vmem:[#allocation8 + $0x74] ss:$8 sps:$4 sm:$0xff]   ;;  %v1677_v8 = vld [vmem:[#allocation8 + $0x70] ss:$8 sps:$4 sm:$0xff]  }
  0x6c   :  { %1510 = vmatprep.subr.bf16.mxu0 %v1886_v0  ;;  %v1683_v13 = vld [vmem:[#allocation7 + $0xc4] sm:$0xff]   ;;  %v274_v14 = vsub.s32 2, %v2017_v20  ;;  %v1701_v48 = vld [vmem:[#allocation7 + $0x114] sm:$0xff]  }
  0x6e   :  { %1493 = vmatpush3.bf16.msra.mxu1 %v1623_v9  ;;  %v1682_v9 = vld [vmem:[#allocation8 + $0xf4] ss:$8 sps:$4 sm:$0xff]   ;;  %v275_v15 = vrot.slane %v2020_v22, %v274_v14 }
  0x6f   :  { %1494 = vmatprep.subr.bf16.mxu1 %v1886_v0  ;;  %1511 = vmatpush3.bf16.msra.mxu0 %v1630_v16 }
  0x70   :  { %1512 = vmatprep.subr.bf16.mxu0 %v1886_v0 }
  0x72   :  { %1495 = vmatpush3.bf16.msra.mxu1 %v1624_v10  ;;  %v1680_v10 = vld [vmem:[#allocation8 + $0xf0] ss:$8 sps:$4 sm:$0xff]  }
  0x73   :  { %1496 = vmatprep.subr.bf16.mxu1 %v1886_v0  ;;  %1513 = vmatpush3.bf16.msra.mxu0 %v1631_v17 }
  0x74   :  { %1514 = vmatprep.subr.bf16.mxu0 %v1886_v0 }
  0x76   :  { %1497 = vmatpush3.bf16.msra.mxu1 %v1625_v11  ;;  %v1888_v11 = vmov 0  }
  0x77   :  { %1498 = vmatprep.subr.bf16.mxu1 %v1886_v0  ;;  %1515 = vmatpush3.bf16.msra.mxu0 %v1632_v18 }
  0x78   :  { %1516 = vmatprep.subr.bf16.mxu0 %v1886_v0 }
  0x7a   :  { %1499 = vmatpush3.bf16.msra.mxu1 %v1626_v12  ;;  %v365_v12 = vld [vmem:[#allocation2] sm:$0xf] }
  0x7b   :  { %1517 = vmatpush3.bf16.msra.mxu0 %v1633_v31  ;;  %479 = vmatprep.subr.bf16.mxu1 %v1640_v35  ;;  %v1688_v31 = vld [vmem:[#allocation7 + $0x94] sm:$0xff]   ;;  %v1692_v35 = vld [vmem:[#allocation7 + $0xa4] sm:$0xff]  }
  0x7c   :  { %1518 = vmatprep.subr.bf16.mxu0 %v1886_v0 }
  0x7f   :  { %1519 = vmatpush3.bf16.msra.mxu0 %v1634_v32  ;;  %v1689_v32 = vld [vmem:[#allocation7 + $0xdc] sm:$0xff]  }
  0x80   :  { %600 = vmatprep.subr.bf16.mxu0 %v1637_v33  ;;  %v1690_v33 = vld [vmem:[#allocation7 + $0x9c] sm:$0xff]  }
 0x134   :  { %v138_v24 = vpop.f32.mrb[0].mxu0 }
 0x135   :  { %v139_v25 = vadd.f32 %v138_v24, %v95_v23  ;;  %v1482_v26 = vpop.f32.mrb[1].mxu0 }
 0x136   :  { %v141_v27 = vpop.f32.mrb[2].mxu0  ;;  %v1684_v26 = vld [vmem:[#allocation7 + $0x84] sm:$0xff]  }
 0x137   :  { %v144_v28 = vmax.f32 %v139_v25, 0.0  ;;  %v1483_v29 = vpop.f32.mrb[3].mxu0 }
 0x138   :  { %v1686_v29 = vld [vmem:[#allocation7 + $0x8c] sm:$0xff]  }
 0x139   :  { %v145_v30 = vpack.c.bf16 %v144_v28, %v144_v28  ;;  %v1685_v28 = vld [vmem:[#allocation7 + $0xcc] sm:$0xff]  }
 0x13b   :  { %1501 = vmatmul.mubr.bf16.vlgmr.msra.gmra.mrb[0].mxu1 %v145_v30  ;;  %v1687_v30 = vld [vmem:[#allocation7 + $0xd4] sm:$0xff]  }
 0x13c   :  { %480 = vmatpush1.bf16.msra.mxu1 %v1638_v34  ;;  %511 = vmatprep.mubr.bf16.mxu1 %v1888_v11  ;;  %v1691_v34 = vld [vmem:[#allocation7 + $0xe4] sm:$0xff]  }
 0x13d   :  { %481 = vmatprep.subr.bf16.mxu1 %v1646_v37 }
 0x140   :  { %482 = vmatpush1.bf16.msra.mxu1 %v1644_v36  ;;  %v1693_v36 = vld [vmem:[#allocation7 + $0xec] sm:$0xff]  }
 0x141   :  { %483 = vmatprep.subr.bf16.mxu1 %v1652_v39  ;;  %v1694_v39 = vld [vmem:[#allocation7 + $0xac] sm:$0xff]  }
 0x144   :  { %484 = vmatpush1.bf16.msra.mxu1 %v1650_v38 }
 0x145   :  { %485 = vmatprep.subr.bf16.mxu1 %v1658_v41 }
 0x148   :  { %486 = vmatpush1.bf16.msra.mxu1 %v1656_v40 }
 0x149   :  { %487 = vmatprep.subr.bf16.mxu1 %v1664_v43  ;;  %v1696_v43 = vld [vmem:[#allocation7 + $0xb4] sm:$0xff]  }
 0x14c   :  { %488 = vmatpush1.bf16.msra.mxu1 %v1662_v42  ;;  %v1695_v42 = vld [vmem:[#allocation7 + $0xf4] sm:$0xff]  }
 0x14d   :  { %489 = vmatprep.subr.bf16.mxu1 %v1670_v45  ;;  %v1698_v45 = vld [vmem:[#allocation7 + $0xbc] sm:$0xff]  }
 0x150   :  { %490 = vmatpush1.bf16.msra.mxu1 %v1668_v44  ;;  %v1697_v44 = vld [vmem:[#allocation7 + $0xfc] sm:$0xff]  }
 0x151   :  { %491 = vmatprep.subr.bf16.mxu1 %v1676_v47  ;;  %v1700_v47 = vld [vmem:[#allocation7 + $0x10c] sm:$0xff]  }
 0x154   :  { %492 = vmatpush1.bf16.msra.mxu1 %v1674_v46  ;;  %v1699_v46 = vld [vmem:[#allocation7 + $0x104] sm:$0xff]  }
 0x155   :  { %493 = vmatprep.subr.bf16.mxu1 %v1682_v9  ;;  %v1709_v9 = vld [vmem:[#allocation7 + $0x154] sm:$0xff]  }
 0x158   :  { %494 = vmatpush1.bf16.msra.mxu1 %v1680_v10  ;;  %v1710_v10 = vld [vmem:[#allocation7 + $0x15c] sm:$0xff]  }
 0x159   :  { %1420 = vmatprep.subr.bf16.mxu1 %v1683_v13  ;;  %v689_v13 = vsub.s32 4, %v2017_v20 }
 0x20e   :  { %v248_v50 = vpop.f32.mrb[0].mxu1 }
 0x20f   :  { %v249_v51 = vadd.f32 %v248_v50, %v165_v49  ;;  %v1502_v52 = vpop.f32.mrb[1].mxu1  ;;  %v1702_v49 = vld [vmem:[#allocation7 + $0x11c] sm:$0xff]   ;;  %v1703_v50 = vld [vmem:[#allocation7 + $0x124] sm:$0xff]  }
 0x210   :  { %v251_v53 = vpop.f32.mrb[2].mxu1  ;;  %v643_v52 = vsub.s32 3, %v2017_v20 }
 0x211   :  { %v254_v54 = vmax.f32 %v249_v51, 0.0  ;;  %v1503_v55 = vpop.f32.mrb[3].mxu1  ;;  %v1704_v51 = vld [vmem:[#allocation7 + $0x12c] sm:$0xff]  }
 0x212   :  { %v87_v53 = vld [vmem:[#allocation10 + $0x8] sm:$0xff] }
 0x213   :  { %v255_v57 = vpack.c.bf16 %v254_v54, %v254_v54  ;;  %v644_v54 = vrot.slane %v2020_v22, %v643_v52 }
 0x215   :  { %1521 = vmatmul.mubr.bf16.vlgmr.msra.gmra.mrb[4].mxu0 %v255_v57 }
 0x216   :  { %601 = vmatpush1.bf16.msra.mxu0 %v1635_v56  ;;  %632 = vmatprep.mubr.bf16.mxu0 %v1888_v11  ;;  %v648_v56 = vrot.slane %v87_v53, %v643_v52  ;;  %v1711_v11 = vld [vmem:[#allocation7 + $0x164] sm:$0xff]   ;;  %v957_v52 = vsub.s32 6, %v2017_v20 }
 0x217   :  { %602 = vmatprep.subr.bf16.mxu0 %v1643_v58 }
 0x218   :  { %v958_v53 = vrot.slane %v2020_v22, %v957_v52 }
 0x21a   :  { %603 = vmatpush1.bf16.msra.mxu0 %v1641_v59 }
 0x21b   :  { %604 = vmatprep.subr.bf16.mxu0 %v1649_v60 }
 0x21e   :  { %605 = vmatpush1.bf16.msra.mxu0 %v1647_v61 }
 0x21f   :  { %606 = vmatprep.subr.bf16.mxu0 %v1655_v62 }
 0x222   :  { %607 = vmatpush1.bf16.msra.mxu0 %v1653_v63 }
 0x223   :  { %608 = vmatprep.subr.bf16.mxu0 %v1661_v1 }
 0x226   :  { %609 = vmatpush1.bf16.msra.mxu0 %v1659_v2 }
 0x227   :  { %610 = vmatprep.subr.bf16.mxu0 %v1667_v3 }
 0x22a   :  { %611 = vmatpush1.bf16.msra.mxu0 %v1665_v4 }
 0x22b   :  { %612 = vmatprep.subr.bf16.mxu0 %v1673_v5  ;;  %v1705_v5 = vld [vmem:[#allocation7 + $0x134] sm:$0xff]  }
 0x22e   :  { %613 = vmatpush1.bf16.msra.mxu0 %v1671_v6  ;;  %v1706_v6 = vld [vmem:[#allocation7 + $0x13c] sm:$0xff]  }
 0x22f   :  { %614 = vmatprep.subr.bf16.mxu0 %v1679_v7  ;;  %v1707_v7 = vld [vmem:[#allocation7 + $0x144] sm:$0xff]  }
 0x232   :  { %615 = vmatpush1.bf16.msra.mxu0 %v1677_v8  ;;  %v1708_v8 = vld [vmem:[#allocation7 + $0x14c] sm:$0xff]  }
 0x233   :  { %1524 = vmatprep.subr.bf16.mxu0 %v1886_v0 }
 0x235   :  { %633 = vmatmul.mubr.bf16.vlgmr.msra.gmra.mrb[8].mxu0 %v365_v12  ;;  %v1712_v12 = vld [vmem:[#allocation7 + $0x16c] sm:$0xff]  }
 0x236   :  { %1540 = vmatprep.mubr.msk.bf16.mxu0 %vm1887_vm0, %v1886_v0  ;;  %1525 = vmatpush3.bf16.msra.mxu0 %v1699_v46  ;;  %v1723_v46 = vld [vmem:[#allocation7 + $0x1c4] sm:$0xff]  }
 0x237   :  { %1526 = vmatprep.subr.bf16.mxu0 %v1886_v0 }
 0x23a   :  { %1527 = vmatpush3.bf16.msra.mxu0 %v1700_v47  ;;  %v1724_v47 = vld [vmem:[#allocation7 + $0x1cc] sm:$0xff]  }
 0x23b   :  { %1528 = vmatprep.subr.bf16.mxu0 %v1886_v0 }
 0x23e   :  { %1529 = vmatpush3.bf16.msra.mxu0 %v1701_v48  ;;  %v1725_v48 = vld [vmem:[#allocation7 + $0x1d4] sm:$0xff]  }
 0x23f   :  { %1530 = vmatprep.subr.bf16.mxu0 %v1886_v0 }
 0x242   :  { %1531 = vmatpush3.bf16.msra.mxu0 %v1702_v49  ;;  %v1726_v49 = vld [vmem:[#allocation7 + $0x1dc] sm:$0xff]  }
 0x243   :  { %1532 = vmatprep.subr.bf16.mxu0 %v1886_v0 }
 0x246   :  { %1533 = vmatpush3.bf16.msra.mxu0 %v1703_v50  ;;  %v1727_v50 = vld [vmem:[#allocation7 + $0x1e4] sm:$0xff]  }
 0x247   :  { %1534 = vmatprep.subr.bf16.mxu0 %v1886_v0 }
 0x24a   :  { %1535 = vmatpush3.bf16.msra.mxu0 %v1704_v51  ;;  %v1728_v51 = vld [vmem:[#allocation7 + $0x1ec] sm:$0xff]  }
 0x24b   :  { %1536 = vmatprep.subr.bf16.mxu0 %v1886_v0 }
 0x24e   :  { %1537 = vmatpush3.bf16.msra.mxu0 %v1705_v5 }
 0x24f   :  { %1538 = vmatprep.subr.bf16.mxu0 %v1886_v0 }
 0x252   :  { %1539 = vmatpush3.bf16.msra.mxu0 %v1706_v6 }
 0x253   :  { %1564 = vmatprep.subr.bf16.mxu0 %v1886_v0 }
 0x2e8   :  { %v358_v16 = vpop.f32.mrb[4].mxu0 }
 0x2e9   :  { %v359_v17 = vadd.f32 %v358_v16, %v275_v15  ;;  %v1522_v18 = vpop.f32.mrb[5].mxu0  ;;  %v690_v15 = vrot.slane %v2020_v22, %v689_v13 }
 0x2ea   :  { %v361_v23 = vpop.f32.mrb[6].mxu0 }
 0x2eb   :  { %v364_v24 = vmax.f32 %v359_v17, 0.0  ;;  %v1523_v25 = vpop.f32.mrb[7].mxu0 }
 0x2ed   :  { %v382_v27 = vpack.c.bf16 %v364_v24, %v364_v24 }
 0x2ef   :  { %512 = vmatmul.mubr.bf16.vlgmr.msra.gmra.mrb[4].mxu1 %v382_v27  ;;  %v1713_v27 = vld [vmem:[#allocation7 + $0x174] sm:$0xff]  }
 0x2f0   :  { %1421 = vmatpush3.bf16.msra.mxu1 %v1684_v26 }
 0x2f1   :  { %1422 = vmatprep.subr.bf16.mxu1 %v1685_v28  ;;  %v1714_v28 = vld [vmem:[#allocation7 + $0x17c] sm:$0xff]  }
 0x2f4   :  { %1423 = vmatpush3.bf16.msra.mxu1 %v1686_v29  ;;  %v1715_v29 = vld [vmem:[#allocation7 + $0x184] sm:$0xff]  }
 0x2f5   :  { %1424 = vmatprep.subr.bf16.mxu1 %v1687_v30  ;;  %v1716_v30 = vld [vmem:[#allocation7 + $0x18c] sm:$0xff]  }
 0x2f8   :  { %1425 = vmatpush3.bf16.msra.mxu1 %v1688_v31  ;;  %v1717_v31 = vld [vmem:[#allocation7 + $0x194] sm:$0xff]  }
 0x2f9   :  { %1426 = vmatprep.subr.bf16.mxu1 %v1689_v32  ;;  %v1718_v32 = vld [vmem:[#allocation7 + $0x19c] sm:$0xff]  }
 0x2fc   :  { %1427 = vmatpush3.bf16.msra.mxu1 %v1690_v33  ;;  %v1719_v33 = vld [vmem:[#allocation7 + $0x1a4] sm:$0xff]  }
 0x2fd   :  { %1428 = vmatprep.subr.bf16.mxu1 %v1691_v34  ;;  %v1720_v34 = vld [vmem:[#allocation7 + $0x1ac] sm:$0xff]  }
 0x300   :  { %1429 = vmatpush3.bf16.msra.mxu1 %v1692_v35  ;;  %v847_v35 = vsub.s32 5, %v2017_v20 }
 0x301   :  { %1430 = vmatprep.subr.bf16.mxu1 %v1693_v36 }
 0x302   :  { %v848_v36 = vrot.slane %v2020_v22, %v847_v35 }
 0x304   :  { %1431 = vmatpush3.bf16.msra.mxu1 %v1694_v39 }
 0x305   :  { %1432 = vmatprep.subr.bf16.mxu1 %v1695_v42 }
 0x308   :  { %v634_v37 = vpop.f32.mrb[8].mxu0  ;;  %1433 = vmatpush3.bf16.msra.mxu1 %v1696_v43 }
 0x309   :  { %v636_v38 = vpop.f32.mrb[9].mxu0  ;;  %1434 = vmatprep.subr.bf16.mxu1 %v1697_v44  ;;  %v1721_v44 = vld [vmem:[#allocation7 + $0x1b4] sm:$0xff]  }
 0x30a   :  { %v638_v40 = vpop.f32.mrb[10].mxu0 }
 0x30b   :  { %v639_v41 = vpop.f32.mrb[11].mxu0 }
 0x30c   :  { %1435 = vmatpush3.bf16.msra.mxu1 %v1698_v45  ;;  %v1722_v45 = vld [vmem:[#allocation7 + $0x1bc] sm:$0xff]  }
 0x30d   :  { %1544 = vmatprep.subr.bf16.mxu1 %v1886_v0 }
 0x3c2   :  { %v513_v55 = vpop.f32.mrb[4].mxu1 }
 0x3c3   :  { %v635_v57 = vadd.f32 %v634_v37, %v513_v55  ;;  %v515_v58 = vpop.f32.mrb[5].mxu1 }
 0x3c4   :  { %v637_v59 = vadd.f32 %v636_v38, %v515_v58  ;;  %v517_v60 = vpop.f32.mrb[6].mxu1 }
 0x3c5   :  { %v649_v61 = vadd.f32 %v644_v54, %v635_v57  ;;  %v518_v62 = vpop.f32.mrb[7].mxu1 }
 0x3c6   :  { %v650_v63 = vadd.f32 %v648_v56, %v637_v59  ;;  %v1730_v62 = vld [vmem:[#allocation7 + $0x1fc] sm:$0xff]  }
 0x3c7   :  { %v651_v1 = vmax.f32 %v649_v61, 0.0  ;;  %v1729_v61 = vld [vmem:[#allocation7 + $0x1f4] sm:$0xff]  }
 0x3c8   :  { %v652_v2 = vmax.f32 %v650_v63, 0.0  ;;  %v1067_v63 = vsub.s32 7, %v2017_v20 }
 0x3c9   :  { %v653_v4 = vpack.c.bf16 %v651_v1, %v651_v1 }
 0x3ca   :  { %v654_v3 = vpack.c.bf16 %v652_v2, %v652_v2  ;;  %v1068_v1 = vrot.slane %v2020_v22, %v1067_v63 }
 0x3cc   :  { %819 = vmatprep.mubr.bf16.mxu1 %v654_v3 }
 0x3cd   :  { %820 = vmatmul.mubr.bf16.vlgmr.msra.gmra.mrb[8].mxu1 %v653_v4 }
 0x3ce   :  { %1560 = vmatprep.mubr.msk.bf16.mxu1 %vm1887_vm0, %v1886_v0  ;;  %1545 = vmatpush3.bf16.msra.mxu1 %v1707_v7 }
 0x3cf   :  { %1546 = vmatprep.subr.bf16.mxu1 %v1886_v0 }
 0x3d2   :  { %1547 = vmatpush3.bf16.msra.mxu1 %v1708_v8 }
 0x3d3   :  { %1548 = vmatprep.subr.bf16.mxu1 %v1886_v0 }
 0x3d6   :  { %1549 = vmatpush3.bf16.msra.mxu1 %v1709_v9  ;;  %v1268_v9 = vand.u32 127, %v92_v19 }
 0x3d7   :  { %1550 = vmatprep.subr.bf16.mxu1 %v1886_v0 }
 0x3d8   :  { %vm1269_vm3 = vcmp.ge.s32.totalorder %v1268_v9, 2  ;;  %vm1270_vm4 = vcmp.lt.s32.totalorder %v1268_v9, 9  ;;  %vm1283_vm6 = vcmp.lt.s32.totalorder %v1268_v9, 2 }
 0x3d9   :  { %vm1271_vm5 = vmand %vm1269_vm3, %vm1270_vm4 }
 0x3da   :  { %1551 = vmatpush3.bf16.msra.mxu1 %v1710_v10  ;;  %v88_v10 = vld [vmem:[#allocation10 + $0x10] sm:$0xff] }
 0x3db   :  { %1552 = vmatprep.subr.bf16.mxu1 %v1886_v0 }
 0x3de   :  { %1553 = vmatpush3.bf16.msra.mxu1 %v1711_v11 }
 0x3df   :  { %1554 = vmatprep.subr.bf16.mxu1 %v1886_v0 }
 0x3e2   :  { %1555 = vmatpush3.bf16.msra.mxu1 %v1712_v12 }
 0x3e3   :  { %1556 = vmatprep.subr.bf16.mxu1 %v1886_v0 }
 0x3e6   :  { %1557 = vmatpush3.bf16.msra.mxu1 %v1713_v27 }
 0x3e7   :  { %1558 = vmatprep.subr.bf16.mxu1 %v1886_v0 }
 0x3ea   :  { %1559 = vmatpush3.bf16.msra.mxu1 %v1714_v28 }
 0x3eb   :  { %1584 = vmatprep.subr.bf16.mxu1 %v1886_v0 }
 0x4a0   :  { %v1436_v14 = vpop.f32.mrb[8].mxu1 }
 0x4a1   :  { %v1437_v16 = vpop.f32.mrb[9].mxu1 }
 0x4a2   :  { %v1438_v17 = vadd.f32 %v1437_v16, %v1436_v14  ;;  %v1439_v18 = vpop.f32.mrb[10].mxu1 }
 0x4a3   :  { %v1440_v23 = vpop.f32.mrb[11].mxu1 }
 0x4a4   :  { %v822_v24 = vadd.f32 %v1438_v17, %v690_v15 }
 0x4a6   :  { %v827_v25 = vmax.f32 %v822_v24, 0.0 }
 0x4a8   :  { %v828_v26 = vpack.c.bf16 %v827_v25, %v827_v25 }
 0x4aa   :  { %1541 = vmatmul.mubr.bf16.vlgmr.msra.gmra.mrb[12].mxu0 %v828_v26 }
 0x4ab   :  { %1580 = vmatprep.mubr.msk.bf16.mxu0 %vm1887_vm0, %v1886_v0  ;;  %1565 = vmatpush3.bf16.msra.mxu0 %v1715_v29 }
 0x4ac   :  { %1566 = vmatprep.subr.bf16.mxu0 %v1886_v0 }
 0x4af   :  { %1567 = vmatpush3.bf16.msra.mxu0 %v1716_v30 }
 0x4b0   :  { %1568 = vmatprep.subr.bf16.mxu0 %v1886_v0 }
 0x4b3   :  { %1569 = vmatpush3.bf16.msra.mxu0 %v1717_v31 }
 0x4b4   :  { %1570 = vmatprep.subr.bf16.mxu0 %v1886_v0 }
 0x4b7   :  { %1571 = vmatpush3.bf16.msra.mxu0 %v1718_v32 }
 0x4b8   :  { %1572 = vmatprep.subr.bf16.mxu0 %v1886_v0 }
 0x4bb   :  { %1573 = vmatpush3.bf16.msra.mxu0 %v1719_v33 }
 0x4bc   :  { %1574 = vmatprep.subr.bf16.mxu0 %v1886_v0 }
 0x4bf   :  { %1575 = vmatpush3.bf16.msra.mxu0 %v1720_v34 }
 0x4c0   :  { %1576 = vmatprep.subr.bf16.mxu0 %v1886_v0 }
 0x4c3   :  { %1577 = vmatpush3.bf16.msra.mxu0 %v1721_v44 }
 0x4c4   :  { %1578 = vmatprep.subr.bf16.mxu0 %v1886_v0 }
 0x4c7   :  { %1579 = vmatpush3.bf16.msra.mxu0 %v1722_v45 }
 0x57d   :  { %v931_v37 = vpop.f32.mrb[12].mxu0 }
 0x57e   :  { %v932_v38 = vadd.f32 %v931_v37, %v848_v36  ;;  %v1542_v39 = vpop.f32.mrb[13].mxu0 }
 0x57f   :  { %v934_v40 = vpop.f32.mrb[14].mxu0 }
 0x580   :  { %v937_v41 = vmax.f32 %v932_v38, 0.0  ;;  %v1543_v42 = vpop.f32.mrb[15].mxu0 }
 0x582   :  { %v938_v43 = vpack.c.bf16 %v937_v41, %v937_v41 }
 0x584   :  { %1561 = vmatmul.mubr.bf16.vlgmr.msra.gmra.mrb[12].mxu1 %v938_v43 }
 0x585   :  { %1600 = vmatprep.mubr.msk.bf16.mxu1 %vm1887_vm0, %v1886_v0  ;;  %1585 = vmatpush3.bf16.msra.mxu1 %v1723_v46 }
 0x586   :  { %1586 = vmatprep.subr.bf16.mxu1 %v1886_v0 }
 0x589   :  { %1587 = vmatpush3.bf16.msra.mxu1 %v1724_v47 }
 0x58a   :  { %1588 = vmatprep.subr.bf16.mxu1 %v1886_v0 }
 0x58d   :  { %1589 = vmatpush3.bf16.msra.mxu1 %v1725_v48 }
 0x58e   :  { %1590 = vmatprep.subr.bf16.mxu1 %v1886_v0 }
 0x591   :  { %1591 = vmatpush3.bf16.msra.mxu1 %v1726_v49 }
 0x592   :  { %1592 = vmatprep.subr.bf16.mxu1 %v1886_v0 }
 0x595   :  { %1593 = vmatpush3.bf16.msra.mxu1 %v1727_v50 }
 0x596   :  { %1594 = vmatprep.subr.bf16.mxu1 %v1886_v0 }
 0x599   :  { %1595 = vmatpush3.bf16.msra.mxu1 %v1728_v51 }
 0x59a   :  { %1596 = vmatprep.subr.bf16.mxu1 %v1886_v0 }
 0x59d   :  { %1597 = vmatpush3.bf16.msra.mxu1 %v1729_v61 }
 0x59e   :  { %1598 = vmatprep.subr.bf16.mxu1 %v1886_v0  ;;  %v1178_v0 = vrot.slane %v88_v10, %v94_v21 }
 0x5a1   :  { %1599 = vmatpush3.bf16.msra.mxu1 %v1730_v62 }
 0x657   :  { %v1041_v54 = vpop.f32.mrb[12].mxu1 }
 0x658   :  { %v1042_v55 = vadd.f32 %v1041_v54, %v958_v53  ;;  %v1562_v56 = vpop.f32.mrb[13].mxu1 }
 0x659   :  { %v1044_v57 = vpop.f32.mrb[14].mxu1 }
 0x65a   :  { %v1047_v58 = vmax.f32 %v1042_v55, 0.0  ;;  %v1563_v59 = vpop.f32.mrb[15].mxu1 }
 0x65c   :  { %v1048_v60 = vpack.c.bf16 %v1047_v58, %v1047_v58 }
 0x65e   :  { %1581 = vmatmul.mubr.bf16.vlgmr.msra.gmra.mrb[16].mxu0 %v1048_v60 }
 0x731   :  { %v1151_v2 = vpop.f32.mrb[16].mxu0 }
 0x732   :  { %v1152_v3 = vadd.f32 %v1151_v2, %v1068_v1  ;;  %v1582_v4 = vpop.f32.mrb[17].mxu0 }
 0x733   :  { %v1154_v5 = vpop.f32.mrb[18].mxu0 }
 0x734   :  { %v1157_v6 = vmax.f32 %v1152_v3, 0.0  ;;  %v1583_v7 = vpop.f32.mrb[19].mxu0 }
 0x736   :  { %v1158_v8 = vpack.c.bf16 %v1157_v6, %v1157_v6 }
 0x738   :  { %1601 = vmatmul.mubr.bf16.vlgmr.msra.gmra.mrb[16].mxu1 %v1158_v8 }
 0x80b   :  { %v1261_v11 = vpop.f32.mrb[16].mxu1 }
 0x80c   :  { %v1262_v12 = vadd.f32 %v1261_v11, %v1178_v0  ;;  %v1602_v22 = vpop.f32.mrb[17].mxu1 }
 0x80d   :  { %v1264_v13 = vpop.f32.mrb[18].mxu1 }
 0x80e   :  { %v1603_v14 = vpop.f32.mrb[19].mxu1  ;;  %v1272_v15 = vsel %vm1271_vm5, %v1262_v12, -inf }
 0x80f   :  { %1273 = vmax.xlane.f32.xlu0 %v1272_v15 }
 0x89c   :  { %v1274_v16 = vpop.xlane.xlu0 %1273 }
 0x89d   :  { %v1275_v17 = vsub.f32 %v1262_v12, %v1274_v16 }
 0x89f   :  { %v1276_v18 = vmul.f32 1.442695, %v1275_v17 }
 0x8a1   :  { %1731 = vpow2.f32 %v1276_v18 }
 0x8ab   :  { %v1732_v23 = vpop.eup %1731 }
 0x8ac   :  { %v1278_v19 = vsel %vm1271_vm5, %v1732_v23, 0.0 }
 0x8ad   :  { %1279 = vadd.xlane.f32.xlu0 %v1278_v19 }
 0x93a   :  { %v1280_v24 = vpop.xlane.xlu0 %1279 }
 0x93b   :  { %1733 = vrcp.f32 %v1280_v24 }
 0x945   :  { %v1734_v20 = vpop.eup %1733 }
 0x946   :  { %v1282_v21 = vmul.f32 %v1734_v20, %v1278_v19 }
 0x948   :  { %v1284_v25 = vsel %vm1283_vm6, %v1262_v12, %v1282_v21 }
 0x949   :  { %1285 = vst [vmem:[#allocation11] sm:$0xff] %v1284_v25 }
 0x94a   :  { %1856 = shalt.err (!%p1853_p2)
}
 0x94b   :  { %s1857_s7 = scalar_lea.hbm %s2100_s5, 128 }
 0x94c   :  { %p1858_p3 = scmp.ne.s32.totalorder %s2100_s5, %s1857_s7  ;;  %p1861_p4 = scmp.lt.u32.totalorder %s1857_s7, %s2100_s5 }
 0x94e   :  { %p1863_p5 = pnand %p1861_p4, %p1858_p3 }
 0x950   :  { %1866 = shalt.err (!%p1863_p5)
}
 0x951   :  { %1295 = dma.vmem_to_hbm [thread:$0]  %s1293_s3, 128, %s2100_s5, [#allocation4]  }
 0x952   :  { %1873 = dma.done.wait [#allocation4], 128  }
 0x953   :  { %1874 = vsyncadd [#allocation4], 4294967168 }
 0x954   :  { %1299 = vsyncpa [#allocation3], 1 }
 0x955   :  { %1300 = vsyncpa [#allocation6], 1 }
 0x956   :  { %1301 = vsyncpa [#allocation9], 1 }
 0x957   :  { %1302 = vsyncpa [#allocation4], 1 }

</bundles_post_ra>
